<compile_context>
chip_gen: v5e
topology: v5e:2x2
jax: 0.10.0
libtpu: 0.0.40
codegen_flags: <defaults>
</compile_context>

<pallas_src>
import functools

import jax
import jax.numpy as jnp
from jax import lax
from jax.experimental import pallas as pl
from jax.experimental.pallas import tpu as pltpu

_MIB = 1024 * 1024


def _round_up(x, m):
    return ((x + m - 1) // m) * m


# ---------------------------------------------------------------------------
# Kernel 1: embedding row gather (HBM table -> [Bp, D] VMEM output).
# ---------------------------------------------------------------------------
def _gather_kernel(idx_ref,      # SMEM  [B]      int32 (scalar-prefetched)
                   embed_hbm,    # HBM   [V, D]   (memory_space=pl.ANY)
                   emb_ref,      # VMEM  [Bp, D]  output
                   sem,          # DMA semaphores (B,)
                   *, real_batch, padded_batch, emb_dim):
    # Read every index from SMEM up-front (a .wait() breaks SMEM sst->sld
    # forwarding), then start all copies, then wait on all.
    rows = [idx_ref[i] for i in range(real_batch)]
    copies = [
        pltpu.make_async_copy(embed_hbm.at[pl.ds(rows[i], 1), :],
                              emb_ref.at[pl.ds(i, 1), :],
                              sem.at[i])
        for i in range(real_batch)
    ]
    for c in copies:
        c.start()
    pad = padded_batch - real_batch
    if pad > 0:  # padded rows never issue a DMA; zero them directly (static).
        emb_ref[pl.ds(real_batch, pad), :] = jnp.zeros((pad, emb_dim),
                                                       emb_ref.dtype)
    for c in copies:
        c.wait()


def _gather_rows(idx, embed_weight, padded_batch):
    B = idx.shape[0]
    _, D = embed_weight.shape
    kernel = functools.partial(_gather_kernel, real_batch=B,
                               padded_batch=padded_batch, emb_dim=D)
    return pl.pallas_call(
        kernel,
        out_shape=jax.ShapeDtypeStruct((padded_batch, D), embed_weight.dtype),
        grid_spec=pltpu.PrefetchScalarGridSpec(
            num_scalar_prefetch=1,                         # idx lands in SMEM
            grid=(1,),
            in_specs=[pl.BlockSpec(memory_space=pl.ANY)],  # table stays in HBM
            out_specs=pl.BlockSpec((padded_batch, D),
                                   lambda i, idx_ref: (0, 0)),
            scratch_shapes=[pltpu.SemaphoreType.DMA((B,))],
        ),
        compiler_params=pltpu.CompilerParams(
            dimension_semantics=("arbitrary",)),
    )(idx, embed_weight)


# ---------------------------------------------------------------------------
# Kernel 2: fc1 (Linear) — out[:, tile] = emb @ W[tile, :]^T + b[tile].
# ---------------------------------------------------------------------------
def _linear_kernel(emb_ref,   # VMEM [Bp, D]
                   w_ref,     # VMEM [TV, D]  (PyTorch [out, in] layout, no transpose)
                   b_ref,     # VMEM [1, TV]
                   out_ref):  # VMEM [Bp, TV]
    lhs = emb_ref[...].astype(w_ref.dtype)          # no-op for f32 weights
    acc = lax.dot_general(
        lhs, w_ref[...],
        dimension_numbers=(((1,), (1,)), ((), ())),  # contract on D
        preferred_element_type=jnp.float32)
    out_ref[...] = (acc + b_ref[...].astype(jnp.float32)).astype(out_ref.dtype)


def _plan_tiles(V, D, Bp, w_bytes, *, target_tile_bytes, vmem_budget):
    """Pick a lane-dense V tile from a byte target; pad V to a multiple of it."""
    tv = (target_tile_bytes // (D * w_bytes)) // 128 * 128
    tv = max(128, min(_round_up(V, 128), tv))

    def footprint(t):
        return (2 * t * D * w_bytes       # weight tile, double buffered
                + 2 * Bp * t * 4          # output tile, double buffered
                + 2 * 8 * t * 4           # bias tile (8-sublane padded), 2 bufs
                + 2 * Bp * D * 4)         # gathered embedding block

    while tv > 128 and footprint(tv) > vmem_budget:
        tv -= 128
    return tv, _round_up(V, tv), footprint(tv)


def skipgram_forward(x, embed_weight, fc1_weight, fc1_bias, *,
                     weight_dtype=None, target_tile_bytes=4 * _MIB):
    """x: int [B, 1] (or [B]); returns logits [B, V] float32.

    weight_dtype=jnp.bfloat16 halves streamed HBM bytes on the weight-bound
    matmul (f32 accumulation kept); default None keeps exact f32 parity.
    """
    idx = x.reshape(-1).astype(jnp.int32)           # squeeze(): [B, 1] -> [B]
    B = idx.shape[0]
    V, D = embed_weight.shape
    assert fc1_weight.shape == (V, D)
    assert fc1_bias.shape == (V,)
    assert D % 128 == 0, "embedding_dim must be a multiple of the 128 lane width"

    idx = jnp.clip(idx, 0, V - 1)                   # guard against OOB DMA
    Bp = _round_up(max(B, 1), 8)                    # sublane-legal batch

    # 1) Gather the needed embedding rows (table never enters VMEM wholesale).
    emb = _gather_rows(idx, embed_weight, Bp)

    # 2) Stream the fc1 weight in large row tiles and matmul on the MXU.
    w = fc1_weight if weight_dtype is None else fc1_weight.astype(weight_dtype)
    w_bytes = jnp.dtype(w.dtype).itemsize
    tv, Vp, fp = _plan_tiles(V, D, Bp, w_bytes,
                             target_tile_bytes=target_tile_bytes,
                             vmem_budget=36 * _MIB)
    if Vp != V:                                     # pad V so tv always divides it
        w = jnp.pad(w, ((0, Vp - V), (0, 0)))
        bias = jnp.pad(fc1_bias, (0, Vp - V))
    else:
        bias = fc1_bias
    bias2d = bias.reshape(1, Vp)

    vmem_limit = int(min(48 * _MIB, max(2 * fp, 16 * _MIB)))

    out = pl.pallas_call(
        _linear_kernel,
        out_shape=jax.ShapeDtypeStruct((Bp, Vp), jnp.float32),
        grid_spec=pltpu.PrefetchScalarGridSpec(
            num_scalar_prefetch=0,
            grid=(Vp // tv,),
            in_specs=[
                pl.BlockSpec((Bp, D), lambda j: (0, 0)),   # gathered embeddings
                pl.BlockSpec((tv, D), lambda j: (j, 0)),   # weight row tile
                pl.BlockSpec((1, tv), lambda j: (0, j)),   # bias tile
            ],
            out_specs=pl.BlockSpec((Bp, tv), lambda j: (0, j)),
        ),
        compiler_params=pltpu.CompilerParams(
            dimension_semantics=("parallel",),  # V tiles independent -> megacore OK
            vmem_limit_bytes=vmem_limit),
    )(emb, w, bias2d)

    return out[:B, :V]


def init_params(key, vocab_size, embedding_dim):
    k_emb, k_w, k_b = jax.random.split(key, 3)
    # nn.Embedding init: N(0, 1); padding_idx=0 row zeroed.
    embed_weight = jax.random.normal(k_emb, (vocab_size, embedding_dim),
                                     dtype=jnp.float32)
    embed_weight = embed_weight.at[0].set(0.0)
    # nn.Linear init: U(-1/sqrt(in), 1/sqrt(in)) for weight and bias.
    bound = 1.0 / jnp.sqrt(embedding_dim)
    fc1_weight = jax.random.uniform(k_w, (vocab_size, embedding_dim),
                                    minval=-bound, maxval=bound,
                                    dtype=jnp.float32)
    fc1_bias = jax.random.uniform(k_b, (vocab_size,),
                                  minval=-bound, maxval=bound,
                                  dtype=jnp.float32)
    return embed_weight, fc1_weight, fc1_bias


if __name__ == "__main__":
    # Module defaults: vocab_size=3000 (not a multiple of 128 -> exercises the
    # V-padding path), embedding_dim=128; small batch of center-word indices.
    VOCAB, DIM, BATCH = 3000, 128, 8

    key = jax.random.PRNGKey(0)
    k_params, k_idx = jax.random.split(key)
    embed_w, fc1_w, fc1_b = init_params(k_params, VOCAB, DIM)

    # Skipgram center-word indices, shape [B, 1] like the PyTorch forward.
    x = jax.random.randint(k_idx, (BATCH, 1), 0, VOCAB, dtype=jnp.int32)

    out = skipgram_forward(x, embed_w, fc1_w, fc1_b)
    out = jax.block_until_ready(out)

    # Pure-JAX reference (precision='highest' -> near-exact f32).  Tolerance is
    # loose enough to absorb any difference in MXU f32 pass count between the
    # in-kernel matmul and the XLA reference; a real bug would be O(1) off.
    emb_ref = jnp.take(embed_w, x.reshape(-1), axis=0)               # [B, D]
    ref = jnp.dot(emb_ref, fc1_w.T,
                  precision=lax.Precision.HIGHEST) + fc1_b           # [B, V]
    assert out.shape == (BATCH, VOCAB)
    assert jnp.allclose(out, ref, atol=2e-2, rtol=2e-2), "mismatch vs reference"

    print("KERNEL_OK")
</pallas_src>

<mosaic_0001>
module attributes {stable_mosaic.version = 11 : i64} {
  func.func @_gather_kernel(%arg0: i32, %arg1: memref<8xi32, #tpu.memory_space<smem>>, %arg2: memref<3000x128xf32, #tpu.memory_space<any>>, %arg3: memref<8x128xf32, #tpu.memory_space<vmem>>, %arg4: memref<8x!tpu.dma_semaphore, #tpu.memory_space<semaphore_mem>>) attributes {dimension_semantics = [#tpu.dimension_semantics<arbitrary>], iteration_bounds = array<i64: 1>, scalar_prefetch = 1 : i64, scratch_operands = 1 : i64, tpu.core_type = #tpu.core_type<tc>, window_params = [{}, {pipeline_mode = #tpu.pipeline_mode<synchronous>, transform_indices = @transform_1, window_bounds = array<i64: 8, 128>}]} {
    %c0 = arith.constant 0 : index
    %0 = memref.load %arg1[%c0] : memref<8xi32, #tpu.memory_space<smem>>
    %c1 = arith.constant 1 : index
    %1 = memref.load %arg1[%c1] : memref<8xi32, #tpu.memory_space<smem>>
    %c2 = arith.constant 2 : index
    %2 = memref.load %arg1[%c2] : memref<8xi32, #tpu.memory_space<smem>>
    %c3 = arith.constant 3 : index
    %3 = memref.load %arg1[%c3] : memref<8xi32, #tpu.memory_space<smem>>
    %c4 = arith.constant 4 : index
    %4 = memref.load %arg1[%c4] : memref<8xi32, #tpu.memory_space<smem>>
    %c5 = arith.constant 5 : index
    %5 = memref.load %arg1[%c5] : memref<8xi32, #tpu.memory_space<smem>>
    %c6 = arith.constant 6 : index
    %6 = memref.load %arg1[%c6] : memref<8xi32, #tpu.memory_space<smem>>
    %c7 = arith.constant 7 : index
    %7 = memref.load %arg1[%c7] : memref<8xi32, #tpu.memory_space<smem>>
    %c0_i32 = arith.constant 0 : i32
    %c0_i32_0 = arith.constant 0 : i32
    %8 = tpu.memref_slice %arg2[%0, %c0_i32_0] : memref<3000x128xf32, #tpu.memory_space<any>> -> memref<1x128xf32, #tpu.memory_space<any>>
    %c0_i32_1 = arith.constant 0 : i32
    %c0_i32_2 = arith.constant 0 : i32
    %9 = tpu.memref_slice %arg3[%c0_i32_1, %c0_i32_2] : memref<8x128xf32, #tpu.memory_space<vmem>> -> memref<1x128xf32, #tpu.memory_space<vmem>>
    %10 = tpu.memref_slice %arg4[%c0_i32] : memref<8x!tpu.dma_semaphore, #tpu.memory_space<semaphore_mem>> -> memref<1x!tpu.dma_semaphore, #tpu.memory_space<semaphore_mem>>
    %11 = tpu.memref_squeeze %10 : memref<1x!tpu.dma_semaphore, #tpu.memory_space<semaphore_mem>> -> memref<!tpu.dma_semaphore, #tpu.memory_space<semaphore_mem>>
    tpu.enqueue_dma source(%8 : memref<1x128xf32, #tpu.memory_space<any>>) target(%9 : memref<1x128xf32, #tpu.memory_space<vmem>>) target_semaphore(%11 : memref<!tpu.dma_semaphore, #tpu.memory_space<semaphore_mem>>)
    %c1_i32 = arith.constant 1 : i32
    %c0_i32_3 = arith.constant 0 : i32
    %12 = tpu.memref_slice %arg2[%1, %c0_i32_3] : memref<3000x128xf32, #tpu.memory_space<any>> -> memref<1x128xf32, #tpu.memory_space<any>>
    %c1_i32_4 = arith.constant 1 : i32
    %c0_i32_5 = arith.constant 0 : i32
    %13 = tpu.memref_slice %arg3[%c1_i32_4, %c0_i32_5] : memref<8x128xf32, #tpu.memory_space<vmem>> -> memref<1x128xf32, #tpu.memory_space<vmem>>
    %14 = tpu.memref_slice %arg4[%c1_i32] : memref<8x!tpu.dma_semaphore, #tpu.memory_space<semaphore_mem>> -> memref<1x!tpu.dma_semaphore, #tpu.memory_space<semaphore_mem>>
    %15 = tpu.memref_squeeze %14 : memref<1x!tpu.dma_semaphore, #tpu.memory_space<semaphore_mem>> -> memref<!tpu.dma_semaphore, #tpu.memory_space<semaphore_mem>>
    tpu.enqueue_dma source(%12 : memref<1x128xf32, #tpu.memory_space<any>>) target(%13 : memref<1x128xf32, #tpu.memory_space<vmem>>) target_semaphore(%15 : memref<!tpu.dma_semaphore, #tpu.memory_space<semaphore_mem>>)
    %c2_i32 = arith.constant 2 : i32
    %c0_i32_6 = arith.constant 0 : i32
    %16 = tpu.memref_slice %arg2[%2, %c0_i32_6] : memref<3000x128xf32, #tpu.memory_space<any>> -> memref<1x128xf32, #tpu.memory_space<any>>
    %c2_i32_7 = arith.constant 2 : i32
    %c0_i32_8 = arith.constant 0 : i32
    %17 = tpu.memref_slice %arg3[%c2_i32_7, %c0_i32_8] : memref<8x128xf32, #tpu.memory_space<vmem>> -> memref<1x128xf32, #tpu.memory_space<vmem>>
    %18 = tpu.memref_slice %arg4[%c2_i32] : memref<8x!tpu.dma_semaphore, #tpu.memory_space<semaphore_mem>> -> memref<1x!tpu.dma_semaphore, #tpu.memory_space<semaphore_mem>>
    %19 = tpu.memref_squeeze %18 : memref<1x!tpu.dma_semaphore, #tpu.memory_space<semaphore_mem>> -> memref<!tpu.dma_semaphore, #tpu.memory_space<semaphore_mem>>
    tpu.enqueue_dma source(%16 : memref<1x128xf32, #tpu.memory_space<any>>) target(%17 : memref<1x128xf32, #tpu.memory_space<vmem>>) target_semaphore(%19 : memref<!tpu.dma_semaphore, #tpu.memory_space<semaphore_mem>>)
    %c3_i32 = arith.constant 3 : i32
    %c0_i32_9 = arith.constant 0 : i32
    %20 = tpu.memref_slice %arg2[%3, %c0_i32_9] : memref<3000x128xf32, #tpu.memory_space<any>> -> memref<1x128xf32, #tpu.memory_space<any>>
    %c3_i32_10 = arith.constant 3 : i32
    %c0_i32_11 = arith.constant 0 : i32
    %21 = tpu.memref_slice %arg3[%c3_i32_10, %c0_i32_11] : memref<8x128xf32, #tpu.memory_space<vmem>> -> memref<1x128xf32, #tpu.memory_space<vmem>>
    %22 = tpu.memref_slice %arg4[%c3_i32] : memref<8x!tpu.dma_semaphore, #tpu.memory_space<semaphore_mem>> -> memref<1x!tpu.dma_semaphore, #tpu.memory_space<semaphore_mem>>
    %23 = tpu.memref_squeeze %22 : memref<1x!tpu.dma_semaphore, #tpu.memory_space<semaphore_mem>> -> memref<!tpu.dma_semaphore, #tpu.memory_space<semaphore_mem>>
    tpu.enqueue_dma source(%20 : memref<1x128xf32, #tpu.memory_space<any>>) target(%21 : memref<1x128xf32, #tpu.memory_space<vmem>>) target_semaphore(%23 : memref<!tpu.dma_semaphore, #tpu.memory_space<semaphore_mem>>)
    %c4_i32 = arith.constant 4 : i32
    %c0_i32_12 = arith.constant 0 : i32
    %24 = tpu.memref_slice %arg2[%4, %c0_i32_12] : memref<3000x128xf32, #tpu.memory_space<any>> -> memref<1x128xf32, #tpu.memory_space<any>>
    %c4_i32_13 = arith.constant 4 : i32
    %c0_i32_14 = arith.constant 0 : i32
    %25 = tpu.memref_slice %arg3[%c4_i32_13, %c0_i32_14] : memref<8x128xf32, #tpu.memory_space<vmem>> -> memref<1x128xf32, #tpu.memory_space<vmem>>
    %26 = tpu.memref_slice %arg4[%c4_i32] : memref<8x!tpu.dma_semaphore, #tpu.memory_space<semaphore_mem>> -> memref<1x!tpu.dma_semaphore, #tpu.memory_space<semaphore_mem>>
    %27 = tpu.memref_squeeze %26 : memref<1x!tpu.dma_semaphore, #tpu.memory_space<semaphore_mem>> -> memref<!tpu.dma_semaphore, #tpu.memory_space<semaphore_mem>>
    tpu.enqueue_dma source(%24 : memref<1x128xf32, #tpu.memory_space<any>>) target(%25 : memref<1x128xf32, #tpu.memory_space<vmem>>) target_semaphore(%27 : memref<!tpu.dma_semaphore, #tpu.memory_space<semaphore_mem>>)
    %c5_i32 = arith.constant 5 : i32
    %c0_i32_15 = arith.constant 0 : i32
    %28 = tpu.memref_slice %arg2[%5, %c0_i32_15] : memref<3000x128xf32, #tpu.memory_space<any>> -> memref<1x128xf32, #tpu.memory_space<any>>
    %c5_i32_16 = arith.constant 5 : i32
    %c0_i32_17 = arith.constant 0 : i32
    %29 = tpu.memref_slice %arg3[%c5_i32_16, %c0_i32_17] : memref<8x128xf32, #tpu.memory_space<vmem>> -> memref<1x128xf32, #tpu.memory_space<vmem>>
    %30 = tpu.memref_slice %arg4[%c5_i32] : memref<8x!tpu.dma_semaphore, #tpu.memory_space<semaphore_mem>> -> memref<1x!tpu.dma_semaphore, #tpu.memory_space<semaphore_mem>>
    %31 = tpu.memref_squeeze %30 : memref<1x!tpu.dma_semaphore, #tpu.memory_space<semaphore_mem>> -> memref<!tpu.dma_semaphore, #tpu.memory_space<semaphore_mem>>
    tpu.enqueue_dma source(%28 : memref<1x128xf32, #tpu.memory_space<any>>) target(%29 : memref<1x128xf32, #tpu.memory_space<vmem>>) target_semaphore(%31 : memref<!tpu.dma_semaphore, #tpu.memory_space<semaphore_mem>>)
    %c6_i32 = arith.constant 6 : i32
    %c0_i32_18 = arith.constant 0 : i32
    %32 = tpu.memref_slice %arg2[%6, %c0_i32_18] : memref<3000x128xf32, #tpu.memory_space<any>> -> memref<1x128xf32, #tpu.memory_space<any>>
    %c6_i32_19 = arith.constant 6 : i32
    %c0_i32_20 = arith.constant 0 : i32
    %33 = tpu.memref_slice %arg3[%c6_i32_19, %c0_i32_20] : memref<8x128xf32, #tpu.memory_space<vmem>> -> memref<1x128xf32, #tpu.memory_space<vmem>>
    %34 = tpu.memref_slice %arg4[%c6_i32] : memref<8x!tpu.dma_semaphore, #tpu.memory_space<semaphore_mem>> -> memref<1x!tpu.dma_semaphore, #tpu.memory_space<semaphore_mem>>
    %35 = tpu.memref_squeeze %34 : memref<1x!tpu.dma_semaphore, #tpu.memory_space<semaphore_mem>> -> memref<!tpu.dma_semaphore, #tpu.memory_space<semaphore_mem>>
    tpu.enqueue_dma source(%32 : memref<1x128xf32, #tpu.memory_space<any>>) target(%33 : memref<1x128xf32, #tpu.memory_space<vmem>>) target_semaphore(%35 : memref<!tpu.dma_semaphore, #tpu.memory_space<semaphore_mem>>)
    %c7_i32 = arith.constant 7 : i32
    %c0_i32_21 = arith.constant 0 : i32
    %36 = tpu.memref_slice %arg2[%7, %c0_i32_21] : memref<3000x128xf32, #tpu.memory_space<any>> -> memref<1x128xf32, #tpu.memory_space<any>>
    %c7_i32_22 = arith.constant 7 : i32
    %c0_i32_23 = arith.constant 0 : i32
    %37 = tpu.memref_slice %arg3[%c7_i32_22, %c0_i32_23] : memref<8x128xf32, #tpu.memory_space<vmem>> -> memref<1x128xf32, #tpu.memory_space<vmem>>
    %38 = tpu.memref_slice %arg4[%c7_i32] : memref<8x!tpu.dma_semaphore, #tpu.memory_space<semaphore_mem>> -> memref<1x!tpu.dma_semaphore, #tpu.memory_space<semaphore_mem>>
    %39 = tpu.memref_squeeze %38 : memref<1x!tpu.dma_semaphore, #tpu.memory_space<semaphore_mem>> -> memref<!tpu.dma_semaphore, #tpu.memory_space<semaphore_mem>>
    tpu.enqueue_dma source(%36 : memref<1x128xf32, #tpu.memory_space<any>>) target(%37 : memref<1x128xf32, #tpu.memory_space<vmem>>) target_semaphore(%39 : memref<!tpu.dma_semaphore, #tpu.memory_space<semaphore_mem>>)
    %c0_i32_24 = arith.constant 0 : i32
    %c0_i32_25 = arith.constant 0 : i32
    %40 = tpu.memref_slice %arg2[%0, %c0_i32_25] : memref<3000x128xf32, #tpu.memory_space<any>> -> memref<1x128xf32, #tpu.memory_space<any>>
    %c0_i32_26 = arith.constant 0 : i32
    %c0_i32_27 = arith.constant 0 : i32
    %41 = tpu.memref_slice %arg3[%c0_i32_26, %c0_i32_27] : memref<8x128xf32, #tpu.memory_space<vmem>> -> memref<1x128xf32, #tpu.memory_space<vmem>>
    %42 = tpu.memref_slice %arg4[%c0_i32_24] : memref<8x!tpu.dma_semaphore, #tpu.memory_space<semaphore_mem>> -> memref<1x!tpu.dma_semaphore, #tpu.memory_space<semaphore_mem>>
    %43 = tpu.memref_squeeze %42 : memref<1x!tpu.dma_semaphore, #tpu.memory_space<semaphore_mem>> -> memref<!tpu.dma_semaphore, #tpu.memory_space<semaphore_mem>>
    tpu.wait_dma2 semaphore(%43 : memref<!tpu.dma_semaphore, #tpu.memory_space<semaphore_mem>>) src(%40 : memref<1x128xf32, #tpu.memory_space<any>>) dst(%41 : memref<1x128xf32, #tpu.memory_space<vmem>>)
    %c1_i32_28 = arith.constant 1 : i32
    %c0_i32_29 = arith.constant 0 : i32
    %44 = tpu.memref_slice %arg2[%1, %c0_i32_29] : memref<3000x128xf32, #tpu.memory_space<any>> -> memref<1x128xf32, #tpu.memory_space<any>>
    %c1_i32_30 = arith.constant 1 : i32
    %c0_i32_31 = arith.constant 0 : i32
    %45 = tpu.memref_slice %arg3[%c1_i32_30, %c0_i32_31] : memref<8x128xf32, #tpu.memory_space<vmem>> -> memref<1x128xf32, #tpu.memory_space<vmem>>
    %46 = tpu.memref_slice %arg4[%c1_i32_28] : memref<8x!tpu.dma_semaphore, #tpu.memory_space<semaphore_mem>> -> memref<1x!tpu.dma_semaphore, #tpu.memory_space<semaphore_mem>>
    %47 = tpu.memref_squeeze %46 : memref<1x!tpu.dma_semaphore, #tpu.memory_space<semaphore_mem>> -> memref<!tpu.dma_semaphore, #tpu.memory_space<semaphore_mem>>
    tpu.wait_dma2 semaphore(%47 : memref<!tpu.dma_semaphore, #tpu.memory_space<semaphore_mem>>) src(%44 : memref<1x128xf32, #tpu.memory_space<any>>) dst(%45 : memref<1x128xf32, #tpu.memory_space<vmem>>)
    %c2_i32_32 = arith.constant 2 : i32
    %c0_i32_33 = arith.constant 0 : i32
    %48 = tpu.memref_slice %arg2[%2, %c0_i32_33] : memref<3000x128xf32, #tpu.memory_space<any>> -> memref<1x128xf32, #tpu.memory_space<any>>
    %c2_i32_34 = arith.constant 2 : i32
    %c0_i32_35 = arith.constant 0 : i32
    %49 = tpu.memref_slice %arg3[%c2_i32_34, %c0_i32_35] : memref<8x128xf32, #tpu.memory_space<vmem>> -> memref<1x128xf32, #tpu.memory_space<vmem>>
    %50 = tpu.memref_slice %arg4[%c2_i32_32] : memref<8x!tpu.dma_semaphore, #tpu.memory_space<semaphore_mem>> -> memref<1x!tpu.dma_semaphore, #tpu.memory_space<semaphore_mem>>
    %51 = tpu.memref_squeeze %50 : memref<1x!tpu.dma_semaphore, #tpu.memory_space<semaphore_mem>> -> memref<!tpu.dma_semaphore, #tpu.memory_space<semaphore_mem>>
    tpu.wait_dma2 semaphore(%51 : memref<!tpu.dma_semaphore, #tpu.memory_space<semaphore_mem>>) src(%48 : memref<1x128xf32, #tpu.memory_space<any>>) dst(%49 : memref<1x128xf32, #tpu.memory_space<vmem>>)
    %c3_i32_36 = arith.constant 3 : i32
    %c0_i32_37 = arith.constant 0 : i32
    %52 = tpu.memref_slice %arg2[%3, %c0_i32_37] : memref<3000x128xf32, #tpu.memory_space<any>> -> memref<1x128xf32, #tpu.memory_space<any>>
    %c3_i32_38 = arith.constant 3 : i32
    %c0_i32_39 = arith.constant 0 : i32
    %53 = tpu.memref_slice %arg3[%c3_i32_38, %c0_i32_39] : memref<8x128xf32, #tpu.memory_space<vmem>> -> memref<1x128xf32, #tpu.memory_space<vmem>>
    %54 = tpu.memref_slice %arg4[%c3_i32_36] : memref<8x!tpu.dma_semaphore, #tpu.memory_space<semaphore_mem>> -> memref<1x!tpu.dma_semaphore, #tpu.memory_space<semaphore_mem>>
    %55 = tpu.memref_squeeze %54 : memref<1x!tpu.dma_semaphore, #tpu.memory_space<semaphore_mem>> -> memref<!tpu.dma_semaphore, #tpu.memory_space<semaphore_mem>>
    tpu.wait_dma2 semaphore(%55 : memref<!tpu.dma_semaphore, #tpu.memory_space<semaphore_mem>>) src(%52 : memref<1x128xf32, #tpu.memory_space<any>>) dst(%53 : memref<1x128xf32, #tpu.memory_space<vmem>>)
    %c4_i32_40 = arith.constant 4 : i32
    %c0_i32_41 = arith.constant 0 : i32
    %56 = tpu.memref_slice %arg2[%4, %c0_i32_41] : memref<3000x128xf32, #tpu.memory_space<any>> -> memref<1x128xf32, #tpu.memory_space<any>>
    %c4_i32_42 = arith.constant 4 : i32
    %c0_i32_43 = arith.constant 0 : i32
    %57 = tpu.memref_slice %arg3[%c4_i32_42, %c0_i32_43] : memref<8x128xf32, #tpu.memory_space<vmem>> -> memref<1x128xf32, #tpu.memory_space<vmem>>
    %58 = tpu.memref_slice %arg4[%c4_i32_40] : memref<8x!tpu.dma_semaphore, #tpu.memory_space<semaphore_mem>> -> memref<1x!tpu.dma_semaphore, #tpu.memory_space<semaphore_mem>>
    %59 = tpu.memref_squeeze %58 : memref<1x!tpu.dma_semaphore, #tpu.memory_space<semaphore_mem>> -> memref<!tpu.dma_semaphore, #tpu.memory_space<semaphore_mem>>
    tpu.wait_dma2 semaphore(%59 : memref<!tpu.dma_semaphore, #tpu.memory_space<semaphore_mem>>) src(%56 : memref<1x128xf32, #tpu.memory_space<any>>) dst(%57 : memref<1x128xf32, #tpu.memory_space<vmem>>)
    %c5_i32_44 = arith.constant 5 : i32
    %c0_i32_45 = arith.constant 0 : i32
    %60 = tpu.memref_slice %arg2[%5, %c0_i32_45] : memref<3000x128xf32, #tpu.memory_space<any>> -> memref<1x128xf32, #tpu.memory_space<any>>
    %c5_i32_46 = arith.constant 5 : i32
    %c0_i32_47 = arith.constant 0 : i32
    %61 = tpu.memref_slice %arg3[%c5_i32_46, %c0_i32_47] : memref<8x128xf32, #tpu.memory_space<vmem>> -> memref<1x128xf32, #tpu.memory_space<vmem>>
    %62 = tpu.memref_slice %arg4[%c5_i32_44] : memref<8x!tpu.dma_semaphore, #tpu.memory_space<semaphore_mem>> -> memref<1x!tpu.dma_semaphore, #tpu.memory_space<semaphore_mem>>
    %63 = tpu.memref_squeeze %62 : memref<1x!tpu.dma_semaphore, #tpu.memory_space<semaphore_mem>> -> memref<!tpu.dma_semaphore, #tpu.memory_space<semaphore_mem>>
    tpu.wait_dma2 semaphore(%63 : memref<!tpu.dma_semaphore, #tpu.memory_space<semaphore_mem>>) src(%60 : memref<1x128xf32, #tpu.memory_space<any>>) dst(%61 : memref<1x128xf32, #tpu.memory_space<vmem>>)
    %c6_i32_48 = arith.constant 6 : i32
    %c0_i32_49 = arith.constant 0 : i32
    %64 = tpu.memref_slice %arg2[%6, %c0_i32_49] : memref<3000x128xf32, #tpu.memory_space<any>> -> memref<1x128xf32, #tpu.memory_space<any>>
    %c6_i32_50 = arith.constant 6 : i32
    %c0_i32_51 = arith.constant 0 : i32
    %65 = tpu.memref_slice %arg3[%c6_i32_50, %c0_i32_51] : memref<8x128xf32, #tpu.memory_space<vmem>> -> memref<1x128xf32, #tpu.memory_space<vmem>>
    %66 = tpu.memref_slice %arg4[%c6_i32_48] : memref<8x!tpu.dma_semaphore, #tpu.memory_space<semaphore_mem>> -> memref<1x!tpu.dma_semaphore, #tpu.memory_space<semaphore_mem>>
    %67 = tpu.memref_squeeze %66 : memref<1x!tpu.dma_semaphore, #tpu.memory_space<semaphore_mem>> -> memref<!tpu.dma_semaphore, #tpu.memory_space<semaphore_mem>>
    tpu.wait_dma2 semaphore(%67 : memref<!tpu.dma_semaphore, #tpu.memory_space<semaphore_mem>>) src(%64 : memref<1x128xf32, #tpu.memory_space<any>>) dst(%65 : memref<1x128xf32, #tpu.memory_space<vmem>>)
    %c7_i32_52 = arith.constant 7 : i32
    %c0_i32_53 = arith.constant 0 : i32
    %68 = tpu.memref_slice %arg2[%7, %c0_i32_53] : memref<3000x128xf32, #tpu.memory_space<any>> -> memref<1x128xf32, #tpu.memory_space<any>>
    %c7_i32_54 = arith.constant 7 : i32
    %c0_i32_55 = arith.constant 0 : i32
    %69 = tpu.memref_slice %arg3[%c7_i32_54, %c0_i32_55] : memref<8x128xf32, #tpu.memory_space<vmem>> -> memref<1x128xf32, #tpu.memory_space<vmem>>
    %70 = tpu.memref_slice %arg4[%c7_i32_52] : memref<8x!tpu.dma_semaphore, #tpu.memory_space<semaphore_mem>> -> memref<1x!tpu.dma_semaphore, #tpu.memory_space<semaphore_mem>>
    %71 = tpu.memref_squeeze %70 : memref<1x!tpu.dma_semaphore, #tpu.memory_space<semaphore_mem>> -> memref<!tpu.dma_semaphore, #tpu.memory_space<semaphore_mem>>
    tpu.wait_dma2 semaphore(%71 : memref<!tpu.dma_semaphore, #tpu.memory_space<semaphore_mem>>) src(%68 : memref<1x128xf32, #tpu.memory_space<any>>) dst(%69 : memref<1x128xf32, #tpu.memory_space<vmem>>)
    return
  }
  func.func @transform_1(%arg0: i32, %arg1: memref<8xi32, #tpu.memory_space<smem>>) -> (i32, i32) {
    %c0_i32 = arith.constant 0 : i32
    %c0_i32_0 = arith.constant 0 : i32
    %c0_i32_1 = arith.constant 0 : i32
    return %c0_i32, %c0_i32_0 : i32, i32
  }
}

</mosaic_0001>

<bundles_post_ra>
// kernel: tpu_custom_call.1
= control target key start
LH: loop header
LB: loop body
LE: loop exit
PB: predicated region body
PF: predicated region fallthrough
CT: control target
= control target key end

     0   :  { %s518_s12 = smov [#allocation4]   ;;  %s640_s0 = inlined_call_operand.hbm [shape: s32[8], index: 0, kind: input, shape index: {}]   ;;  %s641_s1 = inlined_call_operand.hbm [shape: f32[3000,128], index: 1, kind: input, shape index: {}]   ;;  %s642_s2 = inlined_call_operand.hbm [shape: f32[8,128], index: 2, kind: output, shape index: {}]  }
   0x1   :  { %s8_s11 = sshll.u32 %s640_s0, 4  ;;  %s9_s11 = int_to_ptr.hbm [resolvable:$true] %s8_s11 }
   0x2   :  { %11 = dma.hbm_to_smem %s9_s11, 16, %s518_s12, [#allocation3] }
   0x3   :  { %498 = dma.done.wait [#allocation3], 16 }
   0x4   :  { %499 = vsyncadd [#allocation3], 4294967280 }
   0x5   :  { %14 = sfence }
   0x6   :  { %15 = vsyncpa [#allocation6], 0  ;;  %s16_s13 = sld [smem:[#allocation4]]  ;;  %s519_s14 = smov [#allocation5]  }
   0x7   :  { %s545_s15 = sshll.u32 %s519_s14, 4  ;;  %s246_s16 = sld [smem:[#allocation4 + $0x1]]  ;;  %s35_s15 = int_to_ptr.vmem [resolvable:$true] %s545_s15 }
   0x8   :  { %s520_s17 = smov [#allocation5 + $0x1]   ;;  %s550_s19 = sld [smem:[#allocation4 + $0x2]] }
   0x9   :  { %s548_s18 = sshll.u32 %s520_s17, 4  ;;  %s521_s0 = smov [#allocation5 + $0x2]   ;;  %s51_s18 = int_to_ptr.vmem [resolvable:$true] %s548_s18 }
   0xa   :  { %s553_s20 = sshll.u32 %s521_s0, 4  ;;  %s555_s21 = sld [smem:[#allocation4 + $0x3]]  ;;  %s67_s20 = int_to_ptr.vmem [resolvable:$true] %s553_s20 }
   0xb   :  { %s567_s6 = scalar_lea.hbm %s641_s1, 3000 }
   0xc   :  { %s24_s24 = scalar_lea.hbm %s641_s1, %s16_s13 }
   0xd   :  { %s32_s25 = sshll.u32 %s24_s24, 4  ;;  %s38_s28 = scalar_lea.hbm %s641_s1, %s246_s16  ;;  %s33_s25 = int_to_ptr.hbm [resolvable:$true] %s32_s25 }
   0xe   :  { %s48_s29 = sshll.u32 %s38_s28, 4  ;;  %s282_s30 = sshra.s32 %s33_s25, 4  ;;  %s283_s30 = int_to_ptr.hbm [resolvable:$true] %s282_s30  ;;  %s49_s29 = int_to_ptr.hbm [resolvable:$true] %s48_s29 }
   0xf   :  { %s284_s3 = scalar_lea.hbm %s283_s30, 1  ;;  %p287_p1 = scmp.lt.s32.totalorder %s283_s30, %s641_s1 }
  0x10   :  { %p285_p0 = scmp.ne.s32.totalorder %s283_s30, %s284_s3  ;;  %p288_p2 = scmp.lt.s32.totalorder %s567_s6, %s284_s3 }
  0x12   :  { %p289_p3 = por %p288_p2, %p287_p1 }
  0x14   :  { %p290_p4 = pnand %p289_p3, %p285_p0 }
  0x16   :  { %293 = shalt.err (!%p290_p4)  }
  0x17   :  { %37 = dma.hbm_to_vmem [thread:$0]  %s33_s25, 16, %s35_s15, [#allocation2] }
  0x18   :  { %s54_s11 = scalar_lea.hbm %s641_s1, %s550_s19  ;;  %s306_s12 = sshra.s32 %s49_s29, 4  ;;  %s307_s12 = int_to_ptr.hbm [resolvable:$true] %s306_s12 }
  0x19   :  { %s308_s13 = scalar_lea.hbm %s307_s12, 1  ;;  %p311_p6 = scmp.lt.s32.totalorder %s307_s12, %s641_s1 }
  0x1a   :  { %p309_p5 = scmp.ne.s32.totalorder %s307_s12, %s308_s13  ;;  %p312_p7 = scmp.lt.s32.totalorder %s567_s6, %s308_s13 }
  0x1c   :  { %p313_p8 = por %p312_p7, %p311_p6 }
  0x1e   :  { %p314_p9 = pnand %p313_p8, %p309_p5 }
  0x20   :  { %317 = shalt.err (!%p314_p9)  }
  0x21   :  { %53 = dma.hbm_to_vmem [thread:$0]  %s49_s29, 16, %s51_s18, [#allocation2 + $0x1] }
  0x22   :  { %s64_s17 = sshll.u32 %s54_s11, 4  ;;  %s70_s22 = scalar_lea.hbm %s641_s1, %s555_s21  ;;  %s65_s17 = int_to_ptr.hbm [resolvable:$true] %s64_s17 }
  0x23   :  { %s80_s23 = sshll.u32 %s70_s22, 4  ;;  %s330_s24 = sshra.s32 %s65_s17, 4  ;;  %s331_s24 = int_to_ptr.hbm [resolvable:$true] %s330_s24  ;;  %s81_s23 = int_to_ptr.hbm [resolvable:$true] %s80_s23 }
  0x24   :  { %s332_s25 = scalar_lea.hbm %s331_s24, 1  ;;  %p335_p11 = scmp.lt.s32.totalorder %s331_s24, %s641_s1 }
  0x25   :  { %p333_p10 = scmp.ne.s32.totalorder %s331_s24, %s332_s25  ;;  %p336_p12 = scmp.lt.s32.totalorder %s567_s6, %s332_s25 }
  0x27   :  { %p337_p13 = por %p336_p12, %p335_p11 }
  0x29   :  { %p338_p0 = pnand %p337_p13, %p333_p10 }
  0x2b   :  { %341 = shalt.err (!%p338_p0)  }
  0x2c   :  { %69 = dma.hbm_to_vmem [thread:$0]  %s65_s17, 16, %s67_s20, [#allocation2 + $0x2] }
  0x2d   :  { %s522_s18 = smov [#allocation5 + $0x3]   ;;  %s249_s28 = sld [smem:[#allocation4 + $0x4]] }
  0x2e   :  { %s82_s21 = sshll.u32 %s522_s18, 4  ;;  %s354_s29 = sshra.s32 %s81_s23, 4  ;;  %s83_s21 = int_to_ptr.vmem [resolvable:$true] %s82_s21  ;;  %s355_s29 = int_to_ptr.hbm [resolvable:$true] %s354_s29 }
  0x2f   :  { %s356_s30 = scalar_lea.hbm %s355_s29, 1  ;;  %p359_p2 = scmp.lt.s32.totalorder %s355_s29, %s641_s1 }
  0x30   :  { %p357_p1 = scmp.ne.s32.totalorder %s355_s29, %s356_s30  ;;  %p360_p3 = scmp.lt.s32.totalorder %s567_s6, %s356_s30 }
  0x32   :  { %p361_p4 = por %p360_p3, %p359_p2 }
  0x34   :  { %p362_p5 = pnand %p361_p4, %p357_p1 }
  0x36   :  { %365 = shalt.err (!%p362_p5)  }
  0x37   :  { %85 = dma.hbm_to_vmem [thread:$0]  %s81_s23, 16, %s83_s21, [#allocation2 + $0x3] }
  0x38   :  { %s523_s5 = smov [#allocation5 + $0x4]   ;;  %s250_s7 = sld [smem:[#allocation4 + $0x5]] }
  0x39   :  { %s98_s20 = sshll.u32 %s523_s5, 4  ;;  %s524_s8 = smov [#allocation5 + $0x5]   ;;  %s99_s20 = int_to_ptr.vmem [resolvable:$true] %s98_s20 }
  0x3a   :  { %s599_s9 = sshll.u32 %s524_s8, 4  ;;  %s251_s10 = sld [smem:[#allocation4 + $0x6]]  ;;  %s115_s9 = int_to_ptr.vmem [resolvable:$true] %s599_s9 }
  0x3b   :  { %s86_s13 = scalar_lea.hbm %s641_s1, %s249_s28  ;;  %s525_s16 = smov [#allocation5 + $0x6]  }
  0x3c   :  { %s96_s14 = sshll.u32 %s86_s13, 4  ;;  %s605_s17 = sshll.u32 %s525_s16, 4  ;;  %s97_s14 = int_to_ptr.hbm [resolvable:$true] %s96_s14  ;;  %s131_s17 = int_to_ptr.vmem [resolvable:$true] %s605_s17 }
  0x3d   :  { %s378_s0 = sshra.s32 %s97_s14, 4  ;;  %s379_s0 = int_to_ptr.hbm [resolvable:$true] %s378_s0 }
  0x3e   :  { %s380_s19 = scalar_lea.hbm %s379_s0, 1  ;;  %p383_p7 = scmp.lt.s32.totalorder %s379_s0, %s641_s1 }
  0x3f   :  { %p381_p6 = scmp.ne.s32.totalorder %s379_s0, %s380_s19  ;;  %p384_p8 = scmp.lt.s32.totalorder %s567_s6, %s380_s19 }
  0x41   :  { %p385_p9 = por %p384_p8, %p383_p7 }
  0x43   :  { %p386_p10 = pnand %p385_p9, %p381_p6 }
  0x45   :  { %389 = shalt.err (!%p386_p10)  }
  0x46   :  { %101 = dma.hbm_to_vmem [thread:$0]  %s97_s14, 16, %s99_s20, [#allocation2 + $0x4] }
  0x47   :  { %s102_s26 = scalar_lea.hbm %s641_s1, %s250_s7  ;;  %s118_s28 = scalar_lea.hbm %s641_s1, %s251_s10 }
  0x48   :  { %s112_s27 = sshll.u32 %s102_s26, 4  ;;  %s128_s29 = sshll.u32 %s118_s28, 4  ;;  %s113_s27 = int_to_ptr.hbm [resolvable:$true] %s112_s27  ;;  %s129_s29 = int_to_ptr.hbm [resolvable:$true] %s128_s29 }
  0x49   :  { %s402_s30 = sshra.s32 %s113_s27, 4  ;;  %s403_s30 = int_to_ptr.hbm [resolvable:$true] %s402_s30 }
  0x4a   :  { %s404_s3 = scalar_lea.hbm %s403_s30, 1  ;;  %p407_p12 = scmp.lt.s32.totalorder %s403_s30, %s641_s1 }
  0x4b   :  { %p405_p11 = scmp.ne.s32.totalorder %s403_s30, %s404_s3  ;;  %p408_p13 = scmp.lt.s32.totalorder %s567_s6, %s404_s3 }
  0x4d   :  { %p409_p0 = por %p408_p13, %p407_p12 }
  0x4f   :  { %p410_p1 = pnand %p409_p0, %p405_p11 }
  0x51   :  { %413 = shalt.err (!%p410_p1)  }
  0x52   :  { %117 = dma.hbm_to_vmem [thread:$0]  %s113_s27, 16, %s115_s9, [#allocation2 + $0x5] }
  0x53   :  { %s252_s20 = sld [smem:[#allocation4 + $0x7]]  ;;  %s426_s7 = sshra.s32 %s129_s29, 4  ;;  %s427_s7 = int_to_ptr.hbm [resolvable:$true] %s426_s7 }
  0x54   :  { %s428_s8 = scalar_lea.hbm %s427_s7, 1  ;;  %p431_p3 = scmp.lt.s32.totalorder %s427_s7, %s641_s1 }
  0x55   :  { %p429_p2 = scmp.ne.s32.totalorder %s427_s7, %s428_s8  ;;  %p432_p4 = scmp.lt.s32.totalorder %s567_s6, %s428_s8 }
  0x57   :  { %p433_p5 = por %p432_p4, %p431_p3 }
  0x59   :  { %p434_p6 = pnand %p433_p5, %p429_p2 }
  0x5b   :  { %437 = shalt.err (!%p434_p6)  }
  0x5c   :  { %133 = dma.hbm_to_vmem [thread:$0]  %s129_s29, 16, %s131_s17, [#allocation2 + $0x6] }
  0x5d   :  { %s526_s12 = smov [#allocation5 + $0x7]   ;;  %s134_s16 = scalar_lea.hbm %s641_s1, %s252_s20 }
  0x5e   :  { %s146_s13 = sshll.u32 %s526_s12, 4  ;;  %s144_s0 = sshll.u32 %s134_s16, 4  ;;  %s147_s13 = int_to_ptr.vmem [resolvable:$true] %s146_s13  ;;  %s145_s0 = int_to_ptr.hbm [resolvable:$true] %s144_s0 }
  0x5f   :  { %s450_s19 = sshra.s32 %s145_s0, 4  ;;  %s451_s19 = int_to_ptr.hbm [resolvable:$true] %s450_s19 }
  0x60   :  { %s452_s22 = scalar_lea.hbm %s451_s19, 1  ;;  %p455_p8 = scmp.lt.s32.totalorder %s451_s19, %s641_s1 }
  0x61   :  { %p453_p7 = scmp.ne.s32.totalorder %s451_s19, %s452_s22  ;;  %p456_p9 = scmp.lt.s32.totalorder %s567_s6, %s452_s22 }
  0x63   :  { %p457_p10 = por %p456_p9, %p455_p8 }
  0x65   :  { %p458_p11 = pnand %p457_p10, %p453_p7 }
  0x67   :  { %461 = shalt.err (!%p458_p11)  }
  0x68   :  { %149 = dma.hbm_to_vmem [thread:$0]  %s145_s0, 16, %s147_s13, [#allocation2 + $0x7] }
  0x69   :  { %500 = dma.done.wait [#allocation2], 16 }
  0x6a   :  { %501 = vsyncadd [#allocation2], 4294967280 }
  0x6b   :  { %502 = dma.done.wait [#allocation2 + $0x1], 16 }
  0x6c   :  { %503 = vsyncadd [#allocation2 + $0x1], 4294967280 }
  0x6d   :  { %504 = dma.done.wait [#allocation2 + $0x2], 16 }
  0x6e   :  { %505 = vsyncadd [#allocation2 + $0x2], 4294967280 }
  0x6f   :  { %506 = dma.done.wait [#allocation2 + $0x3], 16 }
  0x70   :  { %507 = vsyncadd [#allocation2 + $0x3], 4294967280 }
  0x71   :  { %508 = dma.done.wait [#allocation2 + $0x4], 16 }
  0x72   :  { %509 = vsyncadd [#allocation2 + $0x4], 4294967280 }
  0x73   :  { %510 = dma.done.wait [#allocation2 + $0x5], 16 }
  0x74   :  { %511 = vsyncadd [#allocation2 + $0x5], 4294967280 }
  0x75   :  { %512 = dma.done.wait [#allocation2 + $0x6], 16 }
  0x76   :  { %513 = vsyncadd [#allocation2 + $0x6], 4294967280 }
  0x77   :  { %514 = dma.done.wait [#allocation2 + $0x7], 16 }
  0x78   :  { %515 = vsyncadd [#allocation2 + $0x7], 4294967280  ;;  %s174_s17 = sshll.u32 %s642_s2, 4  ;;  %s175_s17 = int_to_ptr.hbm [resolvable:$true] %s174_s17 }
  0x79   :  { %177 = dma.vmem_to_hbm [thread:$0]  %s35_s15, 128, %s175_s17, [#allocation6]  }
  0x7a   :  { %516 = dma.done.wait [#allocation6], 128  }
  0x7b   :  { %517 = vsyncadd [#allocation6], 4294967168 }
  0x7c   :  { %182 = vsyncpa [#allocation6], 1 }
  0x7d   :  { %183 = vsyncmov [#allocation2] }
  0x80   :  { %s184_s25 = vpop.sfrf %183 }
  0x81   :  { %p253_p12 = scmp.ne.s32.totalorder %s184_s25, 0 }
  0x83   :  { %188 = shalt.err (%p253_p12)  }
  0x84   :  { %190 = vsyncmov [#allocation2 + $0x1] }
  0x87   :  { %s191_s26 = vpop.sfrf %190 }
  0x88   :  { %p254_p13 = scmp.ne.s32.totalorder %s191_s26, 0 }
  0x8a   :  { %195 = shalt.err (%p254_p13)  }
  0x8b   :  { %197 = vsyncmov [#allocation2 + $0x2] }
  0x8e   :  { %s198_s27 = vpop.sfrf %197 }
  0x8f   :  { %p255_p0 = scmp.ne.s32.totalorder %s198_s27, 0 }
  0x91   :  { %202 = shalt.err (%p255_p0)  }
  0x92   :  { %204 = vsyncmov [#allocation2 + $0x3] }
  0x95   :  { %s205_s2 = vpop.sfrf %204 }
  0x96   :  { %p256_p1 = scmp.ne.s32.totalorder %s205_s2, 0 }
  0x98   :  { %209 = shalt.err (%p256_p1)  }
  0x99   :  { %211 = vsyncmov [#allocation2 + $0x4] }
  0x9c   :  { %s212_s15 = vpop.sfrf %211 }
  0x9d   :  { %p257_p2 = scmp.ne.s32.totalorder %s212_s15, 0 }
  0x9f   :  { %216 = shalt.err (%p257_p2)  }
  0xa0   :  { %218 = vsyncmov [#allocation2 + $0x5] }
  0xa3   :  { %s219_s18 = vpop.sfrf %218 }
  0xa4   :  { %p258_p3 = scmp.ne.s32.totalorder %s219_s18, 0 }
  0xa6   :  { %223 = shalt.err (%p258_p3)  }
  0xa7   :  { %225 = vsyncmov [#allocation2 + $0x6] }
  0xaa   :  { %s226_s21 = vpop.sfrf %225 }
  0xab   :  { %p259_p4 = scmp.ne.s32.totalorder %s226_s21, 0 }
  0xad   :  { %230 = shalt.err (%p259_p4)  }
  0xae   :  { %232 = vsyncmov [#allocation2 + $0x7] }
  0xb1   :  { %s233_s28 = vpop.sfrf %232 }
  0xb2   :  { %p260_p5 = scmp.ne.s32.totalorder %s233_s28, 0 }
  0xb4   :  { %237 = shalt.err (%p260_p5)  }

</bundles_post_ra>
